<compile_context>
chip_gen: v6e
topology: v6e:2x2x1
jax: 0.10.0
libtpu: 0.0.40
codegen_flags: <defaults>
</compile_context>

<pallas_src>
import functools
import math

import jax
import jax.numpy as jnp
from jax import lax
from jax.experimental import pallas as pl
from jax.experimental.pallas import tpu as pltpu


def _round_up(n, m):
    return ((n + m - 1) // m) * m


def _vmem_capacity_bytes():
    """Per-core VMEM capacity; conservative fallback if the query is unavailable."""
    try:
        cap = int(pltpu.get_tpu_info().vmem_capacity_bytes)
        if cap > 0:
            return cap
    except Exception:
        pass
    return 64 * 1024 * 1024  # v7x per-TC (smallest current generation)


def _vmem_limit_bytes(need_bytes, cap_bytes):
    limit = int(need_bytes * 1.5) + (16 << 20)   # slack for Mosaic internal scratch
    limit = min(limit, int(cap_bytes * 0.9))     # never request ~all of physical VMEM
    return max(limit, min(32 << 20, int(cap_bytes * 0.9)))


def _pick_chunk(total, target, lane=128):
    """Largest multiple of `lane` that divides `total` and is <= ~target."""
    units = total // lane
    t = max(1, min(units, max(1, target // lane)))
    while units % t:
        t -= 1
    return t * lane


_INV_SQRT2 = 1.0 / math.sqrt(2.0)
_GELU_TANH_C = math.sqrt(2.0 / math.pi)


def _gelu(h, approximate):
    if approximate:
        # tanh approximation runs on the EUP (its own VLIW slot) instead of a long
        # VPU erf polynomial; slight numerical deviation from PyTorch's exact GELU.
        return 0.5 * h * (1.0 + jnp.tanh(_GELU_TANH_C * (h + 0.044715 * h * h * h)))
    # Exact GELU (PyTorch nn.GELU default): 0.5 * x * (1 + erf(x / sqrt(2)))
    return 0.5 * h * (1.0 + lax.erf(h * _INV_SQRT2))


# ----------------------------- kernels ---------------------------------------


def _mlp_kernel_resident(x_ref, w1_ref, b1_ref, w2_ref, b2_ref, o_ref, *,
                         approximate_gelu):
    # fc1: [tm, in_p] @ [in_p, hid_p] -> f32 accumulate on the MXU.
    h = jnp.dot(x_ref[...], w1_ref[...], preferred_element_type=jnp.float32)
    h = h + b1_ref[...]                    # b1 is [1, hid_p] (f32), broadcasts
    h = _gelu(h, approximate_gelu)
    # dropout(p=0.0) is identity — skipped.
    out = jnp.dot(h.astype(w2_ref.dtype), w2_ref[...],
                  preferred_element_type=jnp.float32)
    o_ref[...] = (out + b2_ref[...]).astype(o_ref.dtype)


def _mlp_kernel_hidden_chunked(x_ref, w1_ref, b1_ref, w2_ref, b2_ref, o_ref,
                               acc_ref, *, approximate_gelu):
    # Grid = (row_tiles, hidden_chunks); hidden (reduction for fc2) is innermost.
    k = pl.program_id(1)

    @pl.when(k == 0)
    def _():
        acc_ref[...] = jnp.zeros_like(acc_ref)

    h = jnp.dot(x_ref[...], w1_ref[...], preferred_element_type=jnp.float32)
    h = h + b1_ref[...]                    # b1 chunk [1, th]
    h = _gelu(h, approximate_gelu)
    acc_ref[...] += jnp.dot(h.astype(w2_ref.dtype), w2_ref[...],
                            preferred_element_type=jnp.float32)

    @pl.when(k == pl.num_programs(1) - 1)
    def _():
        o_ref[...] = (acc_ref[...] + b2_ref[...]).astype(o_ref.dtype)


# ----------------------------- wrapper ----------------------------------------


def prepare_mlp_params(w1, b1, w2, b2, *, compute_dtype=None, lane_multiple=128):
    """One-time pad + cast of the MLP weights (hoisted out of the per-call path).

    lane_multiple: 128 everywhere; 256 can help MXU occupancy on v6e/v7x for
    transformer-scale feature dims.
    """
    cd = jnp.dtype(compute_dtype) if compute_dtype is not None else jnp.dtype(w1.dtype)
    in_f, hidden = w1.shape
    out_f = w2.shape[1]
    in_p = _round_up(in_f, lane_multiple)
    hid_p = _round_up(hidden, lane_multiple)
    out_p = _round_up(out_f, lane_multiple)
    # Padded weight/bias entries are zero, so padded lanes stay zero through
    # fc1/GELU/fc2 and never leak into the sliced-back result.
    w1p = jnp.pad(w1.astype(cd), ((0, in_p - in_f), (0, hid_p - hidden)))
    b1p = jnp.pad(b1.astype(jnp.float32), (0, hid_p - hidden)).reshape(1, hid_p)
    w2p = jnp.pad(w2.astype(cd), ((0, hid_p - hidden), (0, out_p - out_f)))
    b2p = jnp.pad(b2.astype(jnp.float32), (0, out_p - out_f)).reshape(1, out_p)
    return {
        "w1": w1p, "b1": b1p, "w2": w2p, "b2": b2p,
        "dims": (in_f, hidden, out_f),
        "padded": (in_p, hid_p, out_p),
        "compute_dtype": cd,
    }


def _run_with_fallback(build, args, single_buffer_weights):
    if single_buffer_weights:
        try:
            return build(True)(*args)
        except Exception:
            # Installed JAX may not accept pipeline_mode=pl.Buffered(1) on a
            # pallas_call BlockSpec; fall back to default double-buffering.
            pass
    return build(False)(*args)


def mlp_forward(x, params, *, block_rows=None, block_hidden=None, out_dtype=None,
                approximate_gelu=False, single_buffer_weights=True):
    """x: [B, in_features]; params from prepare_mlp_params(). Returns [B, out_features]."""
    in_f, hidden, out_f = params["dims"]
    in_p, hid_p, out_p = params["padded"]
    cd = params["compute_dtype"]
    w1p, b1p, w2p, b2p = params["w1"], params["b1"], params["w2"], params["b2"]

    B, xf = x.shape
    assert xf == in_f, f"expected {in_f} input features, got {xf}"
    out_dt = jnp.dtype(out_dtype) if out_dtype is not None else jnp.dtype(x.dtype)

    itemsize = cd.itemsize
    row_align = 8 if itemsize >= 4 else 16       # f32: 8 sublanes; bf16 packs 16
    if block_rows is None:
        block_rows = 256                         # amortizes ~0.35 us per grid step
    tm = min(_round_up(block_rows, row_align), _round_up(B, row_align))
    B_p = _round_up(B, tm)
    n_row_tiles = B_p // tm
    # NOTE: on v7x megacore, an even n_row_tiles >= 2 lets the "parallel" row axis
    # split across both TensorCores; on v5e/v6e it is a serial loop either way.

    cap = _vmem_capacity_bytes()
    wbuf = 1 if single_buffer_weights else 2
    out_itemsize = jnp.dtype(out_dt).itemsize
    x_bytes = tm * in_p * itemsize * 2
    o_bytes = tm * out_p * out_itemsize * 2
    resident_w_bytes = ((in_p * hid_p + hid_p * out_p) * itemsize
                        + (hid_p + out_p) * 4) * wbuf
    resident_h_bytes = tm * hid_p * 4            # f32 intermediate (bias + GELU)
    use_chunked = (block_hidden is not None) or (
        resident_w_bytes + resident_h_bytes + x_bytes + o_bytes > cap // 2)

    # Pad / cast x only when actually needed.
    x_c = x.astype(cd)
    if B_p != B or in_p != in_f:
        x_c = jnp.pad(x_c, ((0, B_p - B), (0, in_p - in_f)))

    flops = 2 * B_p * hid_p * (in_p + out_p)
    bytes_accessed = int(B_p * in_p * itemsize
                         + (in_p * hid_p + hid_p * out_p) * itemsize
                         + (hid_p + out_p) * 4
                         + B_p * out_p * out_itemsize)
    cost = pl.CostEstimate(flops=int(flops), transcendentals=int(B_p * hid_p),
                           bytes_accessed=bytes_accessed)
    args = (x_c, w1p, b1p, w2p, b2p)

    if not use_chunked:
        # ---------------- resident-weight path ----------------
        need = x_bytes + o_bytes + resident_w_bytes + resident_h_bytes
        vmem_limit = _vmem_limit_bytes(need, cap)

        def build(single_buffer):
            def wspec(shape, imap):
                if single_buffer:
                    # Constant index_map -> never re-DMA'd; one buffer is enough.
                    return pl.BlockSpec(shape, imap, pipeline_mode=pl.Buffered(1))
                return pl.BlockSpec(shape, imap)

            kernel = functools.partial(_mlp_kernel_resident,
                                       approximate_gelu=approximate_gelu)
            return pl.pallas_call(
                kernel,
                out_shape=jax.ShapeDtypeStruct((B_p, out_p), out_dt),
                grid_spec=pltpu.PrefetchScalarGridSpec(
                    num_scalar_prefetch=0,
                    grid=(n_row_tiles,),
                    in_specs=[
                        pl.BlockSpec((tm, in_p), lambda i: (i, 0)),   # x tile (pipelined)
                        wspec((in_p, hid_p), lambda i: (0, 0)),       # w1 resident
                        wspec((1, hid_p), lambda i: (0, 0)),          # b1 resident
                        wspec((hid_p, out_p), lambda i: (0, 0)),      # w2 resident
                        wspec((1, out_p), lambda i: (0, 0)),          # b2 resident
                    ],
                    out_specs=pl.BlockSpec((tm, out_p), lambda i: (i, 0)),
                ),
                compiler_params=pltpu.CompilerParams(
                    dimension_semantics=("parallel",),
                    vmem_limit_bytes=vmem_limit,
                ),
                cost_estimate=cost,
            )

        out_padded = _run_with_fallback(build, args, single_buffer_weights)
    else:
        # ---------------- hidden-streaming path ----------------
        target = block_hidden if block_hidden is not None else 512
        th = _pick_chunk(hid_p, max(128, int(target)))
        n_hidden_tiles = hid_p // th
        need = (x_bytes + o_bytes
                + (in_p * th + th * out_p) * itemsize * 2 + th * 4 * 2
                + out_p * 4 * wbuf
                + tm * out_p * 4         # f32 accumulator scratch
                + tm * th * 4)           # f32 GELU chunk intermediate
        vmem_limit = _vmem_limit_bytes(need, cap)

        def build(single_buffer):
            def cspec(shape, imap):
                if single_buffer:
                    return pl.BlockSpec(shape, imap, pipeline_mode=pl.Buffered(1))
                return pl.BlockSpec(shape, imap)

            kernel = functools.partial(_mlp_kernel_hidden_chunked,
                                       approximate_gelu=approximate_gelu)
            return pl.pallas_call(
                kernel,
                out_shape=jax.ShapeDtypeStruct((B_p, out_p), out_dt),
                grid_spec=pltpu.PrefetchScalarGridSpec(
                    num_scalar_prefetch=0,
                    grid=(n_row_tiles, n_hidden_tiles),  # reduction (hidden) axis last
                    in_specs=[
                        pl.BlockSpec((tm, in_p), lambda i, k: (i, 0)),   # x (reused over k)
                        pl.BlockSpec((in_p, th), lambda i, k: (0, k)),   # w1 chunk (streamed)
                        pl.BlockSpec((1, th), lambda i, k: (0, k)),      # b1 chunk
                        pl.BlockSpec((th, out_p), lambda i, k: (k, 0)),  # w2 chunk (streamed)
                        cspec((1, out_p), lambda i, k: (0, 0)),          # b2 resident
                    ],
                    out_specs=pl.BlockSpec((tm, out_p), lambda i, k: (i, 0)),
                    scratch_shapes=[pltpu.VMEM((tm, out_p), jnp.float32)],
                ),
                compiler_params=pltpu.CompilerParams(
                    dimension_semantics=("parallel", "arbitrary"),
                    vmem_limit_bytes=vmem_limit,
                ),
                cost_estimate=cost,
            )

        out_padded = _run_with_fallback(build, args, single_buffer_weights)

    if B_p != B or out_p != out_f:
        return out_padded[:B, :out_f]
    return out_padded


def reference_mlp(x, w1, b1, w2, b2):
    h = x @ w1 + b1
    h = 0.5 * h * (1.0 + lax.erf(h / jnp.sqrt(2.0).astype(h.dtype)))
    return h @ w2 + b2


if __name__ == "__main__":
    key = jax.random.PRNGKey(0)

    def make_params(key, in_f, hidden, out_f):
        k1, k2, k3, k4 = jax.random.split(key, 4)
        bound1 = 1.0 / math.sqrt(in_f)
        bound2 = 1.0 / math.sqrt(hidden)
        w1 = jax.random.uniform(k1, (in_f, hidden), jnp.float32, -bound1, bound1)
        b1 = jax.random.uniform(k2, (hidden,), jnp.float32, -bound1, bound1)
        w2 = jax.random.uniform(k3, (hidden, out_f), jnp.float32, -bound2, bound2)
        b2 = jax.random.uniform(k4, (out_f,), jnp.float32, -bound2, bound2)
        return w1, b1, w2, b2

    # ---- Case 1: tiny shapes, resident-weight path -------------------------
    B, IN_F, HIDDEN, OUT_F = 50, 32, 64, 16
    kp, kx, k2 = jax.random.split(key, 3)
    w1, b1, w2, b2 = make_params(kp, IN_F, HIDDEN, OUT_F)
    x = jax.random.normal(kx, (B, IN_F), jnp.float32)
    ref = reference_mlp(x, w1, b1, w2, b2)

    # f32 MXU inputs.
    params_f32 = prepare_mlp_params(w1, b1, w2, b2, compute_dtype=jnp.float32)
    out_f32 = jax.block_until_ready(mlp_forward(x, params_f32, block_rows=16))
    assert out_f32.shape == (B, OUT_F)
    assert jnp.allclose(out_f32, ref, atol=2e-5, rtol=2e-5), "f32 resident path mismatch"

    # bf16 MXU inputs (perf path): f32 accumulate, looser tolerance.
    params_bf16 = prepare_mlp_params(w1, b1, w2, b2, compute_dtype=jnp.bfloat16)
    out_bf16 = jax.block_until_ready(mlp_forward(x, params_bf16, block_rows=16))
    assert out_bf16.shape == (B, OUT_F)
    assert jnp.allclose(out_bf16, ref, atol=5e-2, rtol=5e-2), "bf16 resident path mismatch"

    # ---- Case 2: hidden-streaming (chunked) path, forced via block_hidden ---
    B2, IN2, HID2, OUT2 = 40, 32, 320, 16
    kp2, kx2 = jax.random.split(k2)
    w1b, b1b, w2b, b2b = make_params(kp2, IN2, HID2, OUT2)
    x2 = jax.random.normal(kx2, (B2, IN2), jnp.float32)
    ref2 = reference_mlp(x2, w1b, b1b, w2b, b2b)

    params2 = prepare_mlp_params(w1b, b1b, w2b, b2b, compute_dtype=jnp.float32)
    out2 = jax.block_until_ready(
        mlp_forward(x2, params2, block_rows=16, block_hidden=128))
    assert out2.shape == (B2, OUT2)
    assert jnp.allclose(out2, ref2, atol=1e-4, rtol=1e-4), "chunked path mismatch"

    print("KERNEL_OK")
</pallas_src>

<mosaic_0001>
module attributes {stable_mosaic.version = 11 : i64} {
  func.func @_mlp_kernel_resident(%arg0: i32, %arg1: memref<16x128xf32, #tpu.memory_space<vmem>>, %arg2: memref<128x128xf32, #tpu.memory_space<vmem>>, %arg3: memref<1x128xf32, #tpu.memory_space<vmem>>, %arg4: memref<128x128xf32, #tpu.memory_space<vmem>>, %arg5: memref<1x128xf32, #tpu.memory_space<vmem>>, %arg6: memref<16x128xf32, #tpu.memory_space<vmem>>) attributes {dimension_semantics = [#tpu.dimension_semantics<parallel>], iteration_bounds = array<i64: 4>, scalar_prefetch = 0 : i64, scratch_operands = 0 : i64, tpu.core_type = #tpu.core_type<tc>, window_params = [{transform_indices = @transform_0, window_bounds = array<i64: 16, 128>}, {pipeline_mode = #tpu.pipeline_mode<synchronous>, transform_indices = @transform_1, window_bounds = array<i64: 128, 128>}, {pipeline_mode = #tpu.pipeline_mode<synchronous>, transform_indices = @transform_2, window_bounds = array<i64: 1, 128>}, {pipeline_mode = #tpu.pipeline_mode<synchronous>, transform_indices = @transform_3, window_bounds = array<i64: 128, 128>}, {pipeline_mode = #tpu.pipeline_mode<synchronous>, transform_indices = @transform_4, window_bounds = array<i64: 1, 128>}, {transform_indices = @transform_5, window_bounds = array<i64: 16, 128>}]} {
    %c0 = arith.constant 0 : index
    %c0_0 = arith.constant 0 : index
    %0 = vector.load %arg1[%c0, %c0_0] : memref<16x128xf32, #tpu.memory_space<vmem>>, vector<16x128xf32>
    %c0_1 = arith.constant 0 : index
    %c0_2 = arith.constant 0 : index
    %1 = vector.load %arg2[%c0_1, %c0_2] : memref<128x128xf32, #tpu.memory_space<vmem>>, vector<128x128xf32>
    %cst = arith.constant dense<0.000000e+00> : vector<16x128xf32>
    %2 = tpu.matmul %0, %1, %cst {dimension_numbers = #tpu.dot_dimension_numbers<[1], [0], [0], [1], [0, 0, 1, 1], [], []>} : vector<16x128xf32>, vector<128x128xf32>, vector<16x128xf32> -> vector<16x128xf32>
    %c0_3 = arith.constant 0 : index
    %c0_4 = arith.constant 0 : index
    %3 = vector.load %arg3[%c0_3, %c0_4] : memref<1x128xf32, #tpu.memory_space<vmem>>, vector<1x128xf32>
    %4 = vector.broadcast %3 : vector<1x128xf32> to vector<16x128xf32>
    %5 = arith.addf %2, %4 : vector<16x128xf32>
    %cst_5 = arith.constant 5.000000e-01 : f32
    %6 = vector.broadcast %cst_5 : f32 to vector<16x128xf32>
    %7 = arith.mulf %6, %5 : vector<16x128xf32>
    %cst_6 = arith.constant 0.707106769 : f32
    %8 = vector.broadcast %cst_6 : f32 to vector<16x128xf32>
    %9 = arith.mulf %5, %8 : vector<16x128xf32>
    %10 = math.erf %9 : vector<16x128xf32>
    %cst_7 = arith.constant 1.000000e+00 : f32
    %11 = vector.broadcast %cst_7 : f32 to vector<16x128xf32>
    %12 = arith.addf %11, %10 : vector<16x128xf32>
    %13 = arith.mulf %7, %12 : vector<16x128xf32>
    %c0_8 = arith.constant 0 : index
    %c0_9 = arith.constant 0 : index
    %14 = vector.load %arg4[%c0_8, %c0_9] : memref<128x128xf32, #tpu.memory_space<vmem>>, vector<128x128xf32>
    %cst_10 = arith.constant dense<0.000000e+00> : vector<16x128xf32>
    %15 = tpu.matmul %13, %14, %cst_10 {dimension_numbers = #tpu.dot_dimension_numbers<[1], [0], [0], [1], [0, 0, 1, 1], [], []>} : vector<16x128xf32>, vector<128x128xf32>, vector<16x128xf32> -> vector<16x128xf32>
    %c0_11 = arith.constant 0 : index
    %c0_12 = arith.constant 0 : index
    %16 = vector.load %arg5[%c0_11, %c0_12] : memref<1x128xf32, #tpu.memory_space<vmem>>, vector<1x128xf32>
    %17 = vector.broadcast %16 : vector<1x128xf32> to vector<16x128xf32>
    %18 = arith.addf %15, %17 : vector<16x128xf32>
    %c0_13 = arith.constant 0 : index
    %c0_14 = arith.constant 0 : index
    %19 = vector.load %arg6[%c0_13, %c0_14] : memref<16x128xf32, #tpu.memory_space<vmem>>, vector<16x128xf32>
    tpu.vector_store %arg6[%c0_13, %c0_14], %18 {strides = array<i32>} : memref<16x128xf32, #tpu.memory_space<vmem>>, vector<16x128xf32>,
    return
  }
  func.func @transform_0(%arg0: i32) -> (i32, i32) {
    %c0_i32 = arith.constant 0 : i32
    %c0_i32_0 = arith.constant 0 : i32
    return %arg0, %c0_i32 : i32, i32
  }
  func.func @transform_1(%arg0: i32) -> (i32, i32) {
    %c0_i32 = arith.constant 0 : i32
    %c0_i32_0 = arith.constant 0 : i32
    %c0_i32_1 = arith.constant 0 : i32
    return %c0_i32, %c0_i32_0 : i32, i32
  }
  func.func @transform_2(%arg0: i32) -> (i32, i32) {
    %c0_i32 = arith.constant 0 : i32
    %c0_i32_0 = arith.constant 0 : i32
    %c0_i32_1 = arith.constant 0 : i32
    return %c0_i32, %c0_i32_0 : i32, i32
  }
  func.func @transform_3(%arg0: i32) -> (i32, i32) {
    %c0_i32 = arith.constant 0 : i32
    %c0_i32_0 = arith.constant 0 : i32
    %c0_i32_1 = arith.constant 0 : i32
    return %c0_i32, %c0_i32_0 : i32, i32
  }
  func.func @transform_4(%arg0: i32) -> (i32, i32) {
    %c0_i32 = arith.constant 0 : i32
    %c0_i32_0 = arith.constant 0 : i32
    %c0_i32_1 = arith.constant 0 : i32
    return %c0_i32, %c0_i32_0 : i32, i32
  }
  func.func @transform_5(%arg0: i32) -> (i32, i32) {
    %c0_i32 = arith.constant 0 : i32
    %c0_i32_0 = arith.constant 0 : i32
    return %arg0, %c0_i32 : i32, i32
  }
}

module attributes {stable_mosaic.version = 11 : i64} {
  func.func @_mlp_kernel_resident(%arg0: i32, %arg1: memref<16x128xf32, #tpu.memory_space<vmem>>, %arg2: memref<128x128xf32, #tpu.memory_space<vmem>>, %arg3: memref<1x128xf32, #tpu.memory_space<vmem>>, %arg4: memref<128x128xf32, #tpu.memory_space<vmem>>, %arg5: memref<1x128xf32, #tpu.memory_space<vmem>>, %arg6: memref<16x128xf32, #tpu.memory_space<vmem>>) attributes {dimension_semantics = [#tpu.dimension_semantics<parallel>], iteration_bounds = array<i64: 4>, scalar_prefetch = 0 : i64, scratch_operands = 0 : i64, tpu.core_type = #tpu.core_type<tc>, window_params = [{transform_indices = @transform_0, window_bounds = array<i64: 16, 128>}, {pipeline_mode = #tpu.pipeline_mode<synchronous>, transform_indices = @transform_1, window_bounds = array<i64: 128, 128>}, {pipeline_mode = #tpu.pipeline_mode<synchronous>, transform_indices = @transform_2, window_bounds = array<i64: 1, 128>}, {pipeline_mode = #tpu.pipeline_mode<synchronous>, transform_indices = @transform_3, window_bounds = array<i64: 128, 128>}, {pipeline_mode = #tpu.pipeline_mode<synchronous>, transform_indices = @transform_4, window_bounds = array<i64: 1, 128>}, {transform_indices = @transform_5, window_bounds = array<i64: 16, 128>}]} {
    %c0 = arith.constant 0 : index
    %c0_0 = arith.constant 0 : index
    %0 = vector.load %arg1[%c0, %c0_0] : memref<16x128xf32, #tpu.memory_space<vmem>>, vector<16x128xf32>
    %c0_1 = arith.constant 0 : index
    %c0_2 = arith.constant 0 : index
    %1 = vector.load %arg2[%c0_1, %c0_2] : memref<128x128xf32, #tpu.memory_space<vmem>>, vector<128x128xf32>
    %cst = arith.constant dense<0.000000e+00> : vector<16x128xf32>
    %2 = tpu.matmul %0, %1, %cst {dimension_numbers = #tpu.dot_dimension_numbers<[1], [0], [0], [1], [0, 0, 1, 1], [], []>} : vector<16x128xf32>, vector<128x128xf32>, vector<16x128xf32> -> vector<16x128xf32>
    %c0_3 = arith.constant 0 : index
    %c0_4 = arith.constant 0 : index
    %3 = vector.load %arg3[%c0_3, %c0_4] : memref<1x128xf32, #tpu.memory_space<vmem>>, vector<1x128xf32>
    %4 = vector.broadcast %3 : vector<1x128xf32> to vector<16x128xf32>
    %5 = arith.addf %2, %4 : vector<16x128xf32>
    %cst_5 = arith.constant 5.000000e-01 : f32
    %6 = vector.broadcast %cst_5 : f32 to vector<16x128xf32>
    %7 = arith.mulf %6, %5 : vector<16x128xf32>
    %cst_6 = arith.constant 0.707106769 : f32
    %8 = vector.broadcast %cst_6 : f32 to vector<16x128xf32>
    %9 = arith.mulf %5, %8 : vector<16x128xf32>
    %10 = math.erf %9 : vector<16x128xf32>
    %cst_7 = arith.constant 1.000000e+00 : f32
    %11 = vector.broadcast %cst_7 : f32 to vector<16x128xf32>
    %12 = arith.addf %11, %10 : vector<16x128xf32>
    %13 = arith.mulf %7, %12 : vector<16x128xf32>
    %c0_8 = arith.constant 0 : index
    %c0_9 = arith.constant 0 : index
    %14 = vector.load %arg4[%c0_8, %c0_9] : memref<128x128xf32, #tpu.memory_space<vmem>>, vector<128x128xf32>
    %cst_10 = arith.constant dense<0.000000e+00> : vector<16x128xf32>
    %15 = tpu.matmul %13, %14, %cst_10 {dimension_numbers = #tpu.dot_dimension_numbers<[1], [0], [0], [1], [0, 0, 1, 1], [], []>} : vector<16x128xf32>, vector<128x128xf32>, vector<16x128xf32> -> vector<16x128xf32>
    %c0_11 = arith.constant 0 : index
    %c0_12 = arith.constant 0 : index
    %16 = vector.load %arg5[%c0_11, %c0_12] : memref<1x128xf32, #tpu.memory_space<vmem>>, vector<1x128xf32>
    %17 = vector.broadcast %16 : vector<1x128xf32> to vector<16x128xf32>
    %18 = arith.addf %15, %17 : vector<16x128xf32>
    %c0_13 = arith.constant 0 : index
    %c0_14 = arith.constant 0 : index
    %19 = vector.load %arg6[%c0_13, %c0_14] : memref<16x128xf32, #tpu.memory_space<vmem>>, vector<16x128xf32>
    tpu.vector_store %arg6[%c0_13, %c0_14], %18 {strides = array<i32>} : memref<16x128xf32, #tpu.memory_space<vmem>>, vector<16x128xf32>,
    return
  }
  func.func @transform_0(%arg0: i32) -> (i32, i32) {
    %c0_i32 = arith.constant 0 : i32
    %c0_i32_0 = arith.constant 0 : i32
    return %arg0, %c0_i32 : i32, i32
  }
  func.func @transform_1(%arg0: i32) -> (i32, i32) {
    %c0_i32 = arith.constant 0 : i32
    %c0_i32_0 = arith.constant 0 : i32
    %c0_i32_1 = arith.constant 0 : i32
    return %c0_i32, %c0_i32_0 : i32, i32
  }
  func.func @transform_2(%arg0: i32) -> (i32, i32) {
    %c0_i32 = arith.constant 0 : i32
    %c0_i32_0 = arith.constant 0 : i32
    %c0_i32_1 = arith.constant 0 : i32
    return %c0_i32, %c0_i32_0 : i32, i32
  }
  func.func @transform_3(%arg0: i32) -> (i32, i32) {
    %c0_i32 = arith.constant 0 : i32
    %c0_i32_0 = arith.constant 0 : i32
    %c0_i32_1 = arith.constant 0 : i32
    return %c0_i32, %c0_i32_0 : i32, i32
  }
  func.func @transform_4(%arg0: i32) -> (i32, i32) {
    %c0_i32 = arith.constant 0 : i32
    %c0_i32_0 = arith.constant 0 : i32
    %c0_i32_1 = arith.constant 0 : i32
    return %c0_i32, %c0_i32_0 : i32, i32
  }
  func.func @transform_5(%arg0: i32) -> (i32, i32) {
    %c0_i32 = arith.constant 0 : i32
    %c0_i32_0 = arith.constant 0 : i32
    return %arg0, %c0_i32 : i32, i32
  }
}

</mosaic_0001>

<bundles_post_ra>
// kernel: tpu_custom_call.1
= control target key start
LH: loop header
LB: loop body
LE: loop exit
PB: predicated region body
PF: predicated region fallthrough
CT: control target
= control target key end

     0   :  { %10 = vsyncpa [#allocation3], 0  ;;  %s1190_s0 = inlined_call_operand.hbm [shape: f32[64,128], index: 0, kind: input, shape index: {}]   ;;  %s1191_s1 = inlined_call_operand.hbm [shape: f32[128,128], index: 1, kind: input, shape index: {}]   ;;  %s1192_s2 = inlined_call_operand.vmem [shape: f32[1,128], index: 2, kind: input, shape index: {}]   ;;  %s1193_s3 = inlined_call_operand.hbm [shape: f32[128,128], index: 3, kind: input, shape index: {}]   ;;  %s1194_s4 = inlined_call_operand.vmem [shape: f32[1,128], index: 4, kind: input, shape index: {}]   ;;  %s1195_s5 = inlined_call_operand.hbm [shape: f32[64,128], index: 5, kind: output, shape index: {}]  }
   0x1   :  { %12 = vsyncpa [#allocation3 + $0x1], 0 }
   0x2   :  { %13 = vsyncpa [#allocation6], 0 }
   0x3   :  { %14 = vsyncpa [#allocation4], 0 }
   0x4   :  { %16 = vsyncpa [#allocation4 + $0x1], 0  ;;  %s981_s18 = smov 0   ;;  %s983_s19 = smov 0  }
   0x5   :  { %s985_s20 = smov 0   ;;  %s987_s21 = smov 0  }
   0x6 LB: > { %s1002_s22 = sadd.s32 4294967295, %s941_s21   ;;  %s590_s23 = sadd.s32 4294967294, %s941_s21   ;;  %s941_s21 = sphi %s987_s21, %s1217_s21   ;;  %s937_s20 = sphi %s985_s20, %s1216_s20   ;;  %s933_s19 = sphi %s983_s19, %s1215_s19   ;;  %s929_s18 = sphi %s981_s18, %s1214_s18  }
   0x7   : > { %p42_p0 = scmp.ne.s32.totalorder %s933_s19, %s929_s18  ;;  %p1196_p1 = scmp.eq.s32.totalorder %s1002_s22, 0 }
   0x8   : > { %p150_p2 = scmp.eq.s32.totalorder %s1002_s22, 3  ;;  %p156_p3 = scmp.eq.s32.totalorder %s590_s23, 3 }
   0x9   : > { %p1011_p4 = por %p1196_p1, %p42_p0  ;;  %p591_p5 = scmp.ge.s32.totalorder %s941_s21, 1 }
   0xa   : > { %p1016_p6 = por %p156_p3, %p42_p0  ;;  %p163_p7 = scmp.lt.s32.totalorder %s941_s21, 5 }
   0xb   : > { %s1201_s24 = scalar_select %p1011_p4, 1, 0 }
   0xc   : > { %s1202_s25 = scalar_select %p1016_p6, 1, 0 }
   0xd   : > { %p1021_p8 = pnand %p591_p5, %p163_p7  ;;  %s943_s27 = smov [#allocation5]  }
   0xe   : > { %s175_s28 = sshll.u32 %s943_s27, 4  ;;  %s944_s30 = smov [#allocation7]   ;;  %s176_s28 = int_to_ptr.vmem [resolvable:$true] %s175_s28 }
   0xf   : > { %s1203_s26 = scalar_select %p1021_p8, 1, 0 }
  0x10   : > { %p730_p9 = pneg %p1021_p8  ;;  %s191_s6 = sshll.u32 %s944_s30, 4  ;;  %s192_s6 = int_to_ptr.vmem [resolvable:$true] %s191_s6 }
  0x11   : > { %s804_s7 = scalar_lea.vmem %s176_s28, 2048  ;;  %p812_p3 = scmp.lt.s32.totalorder %s176_s28, %s176_s28 }
  0x12   : > { %p1029_p10 = pnand %p730_p9, %p1196_p1  ;;  %p805_p12 = scmp.ne.s32.totalorder %s176_s28, %s804_s7 }
  0x13   : > { %p813_p5 = scmp.lt.s32.totalorder %s804_s7, %s804_s7 }
  0x14   : > { %p795_p11 = pneg %p1029_p10 }
  0x15   : > { %p814_p7 = por %p813_p5, %p812_p3 }
  0x16   : > { %p807_p13 = pnand %p805_p12, %p795_p11 }
  0x18   : > { %p808_p0 = pneg %p807_p13 }
  0x1a   : > { %p815_p9 = pnand %p814_p7, %p808_p0 }
  0x1c   : > { %818 = shalt.err (!%p815_p9)
}
  0x1d   : > { %s1197_s8 = smov 128   ;;  %s946_s9 = smov 8  }
  0x1e   : > { %733 = dma.hbm_to_vmem [thread:$0]  (!%p1029_p10), %s1191_s1, 2048, %s176_s28, [#allocation6], %s1197_s8, %s1197_s8, %s946_s9  }
  0x1f   : > { %s830_s12 = scalar_lea.vmem %s192_s6, 2048  ;;  %p838_p0 = scmp.lt.s32.totalorder %s192_s6, %s192_s6 }
  0x20   : > { %p831_p12 = scmp.ne.s32.totalorder %s192_s6, %s830_s12  ;;  %p839_p5 = scmp.lt.s32.totalorder %s830_s12, %s830_s12 }
  0x22   : > { %p833_p13 = pnand %p831_p12, %p795_p11  ;;  %p840_p7 = por %p839_p5, %p838_p0 }
  0x24   : > { %p834_p3 = pneg %p833_p13 }
  0x26   : > { %p841_p9 = pnand %p840_p7, %p834_p3 }
  0x28   : > { %844 = shalt.err (!%p841_p9)
}
  0x29   : > { %736 = dma.hbm_to_vmem [thread:$0]  (!%p1029_p10), %s1193_s3, 2048, %s192_s6, [#allocation6], %s1197_s8, %s1197_s8, %s946_s9  }
  0x2a   : > { %s1058_s15 = sadd.s32 1, %s941_s21   ;;  %s29_s16 = sadd.s32 1, %s937_s20 }
  0x2b   : > { %s26_s17 = ssub.s32 %s941_s21, %s1058_s15  ;;  %p36_p11 = scmp.ne.s32.totalorder %s937_s20, %s933_s19 }
  0x2c   : > { %p27_p12 = scmp.eq.s32.totalorder %s26_s17, 0  ;;  %p37_p13 = scmp.eq.s32.totalorder %s941_s21, 0 }
  0x2d   : > { %p1068_p3 = por %p150_p2, %p36_p11  ;;  %p747_p0 = scmp.lt.s32.totalorder %s941_s21, 4 }
  0x2e   : > { %s1074_s27 = scalar_select %p27_p12, %s937_s20, %s29_s16  }
  0x2f   : > { %s1205_s23 = scalar_select %p1068_p3, 1, 0 }
  0x30   : > { %p38_p5 = por %p37_p13, %p36_p11  ;;  %s208_s28 = sand.u32 1, %s937_s20  }
  0x31   : > { %s595_s29 = sshll.u32 %s208_s28, 4  ;;  %s610_s30 = sshll.u32 %s941_s21, 8 }
  0x32   : > { %s1081_s10 = scalar_lea.hbm %s1190_s0, %s610_s30  ;;  %s212_s11 = scalar_lea.vmem [#allocation2], %s595_s29 }
  0x33   : > { %s219_s12 = sshll.u32 %s212_s11, 4  ;;  %p1085_p2 = pnand %p747_p0, %p38_p5  ;;  %s1083_s12 = int_to_ptr.vmem [resolvable:$true] %s219_s12 }
  0x34   : > { %s1089_s14 = scalar_lea.sflag [#allocation3], %s208_s28  ;;  %s845_s16 = scalar_lea.hbm %s1081_s10, 256 }
  0x35   : > { %p846_p10 = scmp.ne.s32.totalorder %s1081_s10, %s845_s16  ;;  %p847_p7 = pneg %p1085_p2 }
  0x36   : > { %s850_s29 = scalar_lea.hbm %s1190_s0, 1024  ;;  %p851_p12 = scmp.lt.s32.totalorder %s1081_s10, %s1190_s0 }
  0x37   : > { %p848_p9 = pnand %p847_p7, %p846_p10  ;;  %p852_p13 = scmp.lt.s32.totalorder %s850_s29, %s845_s16 }
  0x39   : > { %p849_p11 = pneg %p848_p9  ;;  %p853_p0 = por %p852_p13, %p851_p12 }
  0x3b   : > { %p854_p5 = pnand %p853_p0, %p849_p11 }
  0x3d   : > { %857 = shalt.err (!%p854_p5)
}
  0x3e   : > { %s858_s28 = scalar_lea.vmem %s1083_s12, 256  ;;  %s947_s11 = smov [#allocation2]  }
  0x3f   : > { %p859_p1 = scmp.ne.s32.totalorder %s1083_s12, %s858_s28  ;;  %s863_s8 = sshll.u32 %s947_s11, 4  ;;  %s864_s8 = int_to_ptr.vmem [resolvable:$false] %s863_s8 }
  0x40   : > { %s865_s17 = scalar_lea.vmem %s864_s8, 512  ;;  %p866_p9 = scmp.lt.s32.totalorder %s1083_s12, %s864_s8 }
  0x41   : > { %p861_p6 = pnand %p859_p1, %p847_p7  ;;  %p867_p3 = scmp.lt.s32.totalorder %s865_s17, %s858_s28 }
  0x43   : > { %p862_p10 = pneg %p861_p6  ;;  %p868_p4 = por %p867_p3, %p866_p9 }
  0x45   : > { %p869_p8 = pnand %p868_p4, %p862_p10 }
  0x47   : > { %872 = shalt.err (!%p869_p8)
}
  0x48   : > { %s1207_s16 = smov 128   ;;  %p1208_p1 = scmp.ne.s32.totalorder %s1203_s26, 0 }
  0x49   : > { %740 = dma.hbm_to_vmem [thread:$0]  (!%p1085_p2), %s1081_s10, 256, %s1083_s12, %s1089_s14, %s1207_s16, %s1207_s16, %s946_s9  }
  0x4a   : > { %231 = sbr.rel (%p1208_p1) target bundleno = 545 (0x221), region = 40  ;;  %s1116_s30 = sand.u32 (!%p1208_p1), 1, %s933_s19  }
  0x4b   : > { %s599_s8 = sshll.u32 (!%p1208_p1), %s1116_s30, 4  ;;  %s234_s29 = scalar_lea.sflag (!%p1208_p1), [#allocation3], %s1116_s30 }
  0x4c   : > { %s1122_s13 = scalar_lea.vmem (!%p1208_p1), [#allocation2], %s599_s8  ;;  %p1209_p4 = scmp.ne.s32.totalorder (!%p1208_p1), %s1201_s24, 0 }
  0x4f   : > { %916 = dma.done.wait (%p1209_p4), %s234_s29, 256  }
  0x50   : > { %918 = vsyncadd (%p1209_p4), %s234_s29, 4294967040  ;;  %p1210_p6 = scmp.eq.s32.totalorder %s1002_s22, 0 }
  0x52   : > { %920 = dma.done.wait (%p1210_p6), [#allocation6], 4096   ;;  %p1211_p8 = pmov %p1210_p6 }
  0x53   : > { %v291_v0 = vld [vmem:[#allocation5 + $0x78] sm:$0xff]  ;;  %v290_v1 = vld [vmem:[#allocation5 + $0x70] sm:$0xff]  ;;  %v289_v2 = vld [vmem:[#allocation5 + $0x68] sm:$0xff]  ;;  %s271_s12 = scalar_lea.vmem [#allocation8], %s599_s8  ;;  %s611_s6 = sshll.u32 %s1002_s22, 8 }
  0x54   : > { %922 = vsyncadd (%p1211_p8), [#allocation6], 4294963200  ;;  %648 = vmatprep.subr.mxu0 %v291_v0  ;;  %v288_v3 = vld [vmem:[#allocation5 + $0x60] sm:$0xff]  ;;  %v287_v5 = vld [vmem:[#allocation5 + $0x58] sm:$0xff]  ;;  %s498_s14 = sshll.u32 %s271_s12, 4  ;;  %s1148_s11 = scalar_lea.hbm %s1195_s5, %s611_s6  ;;  %s1143_s14 = int_to_ptr.vmem [resolvable:$true] %s498_s14 }
  0x55   : > { %649 = vmatpush3.msra.mxu0 %v291_v0  ;;  %v274_v4 = vld [vmem:[%s1122_s13] sm:$0xff]  ;;  %v399_v6 = vld [vmem:[#allocation7 + $0x78] sm:$0xff]  ;;  %v397_v9 = vld [vmem:[#allocation7 + $0x68] sm:$0xff]  ;;  %s485_s17 = scalar_lea.sflag [#allocation4], %s1116_s30  ;;  %s873_s16 = scalar_lea.vmem %s1143_s14, 256 }
  0x56   : > { %650 = vmatprep.subr.mxu0 %v290_v1  ;;  %680 = vmatprep.mubr.f32.mxu0 %v274_v4  ;;  %v398_v7 = vld [vmem:[#allocation7 + $0x70] sm:$0xff]  ;;  %v285_v10 = vld [vmem:[#allocation5 + $0x48] sm:$0xff]  ;;  %v284_v11 = vld [vmem:[#allocation5 + $0x40] sm:$0xff]  ;;  %p874_p3 = scmp.ne.s32.totalorder %s1143_s14, %s873_s16  ;;  %p1212_p2 = scmp.ne.s32.totalorder %s1205_s23, 0 }
  0x57   : > { %651 = vmatpush3.msra.mxu0 %v290_v1  ;;  %683 = vmatprep.subr.mxu1 %v399_v6  ;;  %v286_v8 = vld [vmem:[#allocation5 + $0x50] sm:$0xff]  ;;  %v283_v12 = vld [vmem:[#allocation5 + $0x38] sm:$0xff]  ;;  %v281_v14 = vld [vmem:[#allocation5 + $0x28] sm:$0xff]  ;;  %s948_s22 = smov [#allocation8]  }
  0x58   : > { %652 = vmatprep.subr.mxu0 %v289_v2  ;;  %684 = vmatpush3.msra.mxu1 %v399_v6  ;;  %v282_v13 = vld [vmem:[#allocation5 + $0x30] sm:$0xff]  ;;  %v280_v15 = vld [vmem:[#allocation5 + $0x20] sm:$0xff]  ;;  %v279_v16 = vld [vmem:[#allocation5 + $0x18] sm:$0xff]  ;;  %p875_p7 = pnand %p874_p3, %p1212_p2  ;;  %s877_s8 = sshll.u32 %s948_s22, 4  ;;  %s878_s8 = int_to_ptr.vmem [resolvable:$false] %s877_s8 }
  0x59   : > { %653 = vmatpush3.msra.mxu0 %v289_v2  ;;  %685 = vmatprep.subr.mxu1 %v398_v7  ;;  %v278_v17 = vld [vmem:[#allocation5 + $0x10] sm:$0xff]  ;;  %v277_v18 = vld [vmem:[#allocation5 + $0x8] sm:$0xff]  ;;  %v276_v19 = vld [vmem:[#allocation5] sm:$0xff]  ;;  %s879_s29 = scalar_lea.vmem %s878_s8, 512  ;;  %p880_p12 = scmp.lt.s32.totalorder %s1143_s14, %s878_s8 }
  0x5a   : > { %654 = vmatprep.subr.mxu0 %v288_v3  ;;  %686 = vmatpush3.msra.mxu1 %v398_v7  ;;  %v275_v20 = vld [vmem:[%s1122_s13 + $0x8] sm:$0xff]  ;;  %v396_v21 = vld [vmem:[#allocation7 + $0x60] sm:$0xff]  ;;  %v394_v23 = vld [vmem:[#allocation7 + $0x50] sm:$0xff]  ;;  %p876_p11 = pneg %p875_p7  ;;  %p881_p13 = scmp.lt.s32.totalorder %s879_s29, %s873_s16 }
  0x5b   : > { %655 = vmatpush3.msra.mxu0 %v288_v3  ;;  %687 = vmatprep.subr.mxu1 %v397_v9  ;;  %v395_v22 = vld [vmem:[#allocation7 + $0x58] sm:$0xff]  ;;  %v393_v24 = vld [vmem:[#allocation7 + $0x48] sm:$0xff]  ;;  %v392_v25 = vld [vmem:[#allocation7 + $0x40] sm:$0xff] }
  0x5c   : > { %656 = vmatprep.subr.mxu0 %v287_v5  ;;  %688 = vmatpush3.msra.mxu1 %v397_v9  ;;  %v391_v26 = vld [vmem:[#allocation7 + $0x38] sm:$0xff]  ;;  %v390_v27 = vld [vmem:[#allocation7 + $0x30] sm:$0xff]  ;;  %v389_v28 = vld [vmem:[#allocation7 + $0x28] sm:$0xff]  ;;  %p882_p0 = por %p881_p13, %p880_p12 }
  0x5d   : > { %657 = vmatpush3.msra.mxu0 %v287_v5  ;;  %689 = vmatprep.subr.mxu1 %v396_v21  ;;  %v388_v29 = vld [vmem:[#allocation7 + $0x20] sm:$0xff]  ;;  %v387_v30 = vld [vmem:[#allocation7 + $0x18] sm:$0xff]  ;;  %v386_v31 = vld [vmem:[#allocation7 + $0x10] sm:$0xff] }
  0x5e   : > { %658 = vmatprep.subr.mxu0 %v286_v8  ;;  %690 = vmatpush3.msra.mxu1 %v396_v21  ;;  %v385_v32 = vld [vmem:[#allocation7 + $0x8] sm:$0xff]  ;;  %v384_v33 = vld [vmem:[#allocation7] sm:$0xff]  ;;  %p883_p5 = pnand %p882_p0, %p876_p11 }
  0x5f   : > { %659 = vmatpush3.msra.mxu0 %v286_v8  ;;  %691 = vmatprep.subr.mxu1 %v395_v22  ;;  %v603_v34 = vld [vmem:[%s1192_s2] ss:$0 sm:$0xff] }
  0x60   : > { %660 = vmatprep.subr.mxu0 %v285_v10  ;;  %692 = vmatpush3.msra.mxu1 %v395_v22  ;;  %v604_v49 = vld [vmem:[%s1194_s4] ss:$0 sm:$0xff] }
  0x61   : > { %661 = vmatpush3.msra.mxu0 %v285_v10  ;;  %693 = vmatprep.subr.mxu1 %v394_v23 }
  0x62   : > { %662 = vmatprep.subr.mxu0 %v284_v11  ;;  %694 = vmatpush3.msra.mxu1 %v394_v23 }
  0x63   : > { %663 = vmatpush3.msra.mxu0 %v284_v11  ;;  %695 = vmatprep.subr.mxu1 %v393_v24 }
  0x64   : > { %664 = vmatprep.subr.mxu0 %v283_v12  ;;  %696 = vmatpush3.msra.mxu1 %v393_v24 }
  0x65   : > { %665 = vmatpush3.msra.mxu0 %v283_v12  ;;  %697 = vmatprep.subr.mxu1 %v392_v25 }
  0x66   : > { %666 = vmatprep.subr.mxu0 %v282_v13  ;;  %698 = vmatpush3.msra.mxu1 %v392_v25 }
  0x67   : > { %667 = vmatpush3.msra.mxu0 %v282_v13  ;;  %699 = vmatprep.subr.mxu1 %v391_v26 }
  0x68   : > { %668 = vmatprep.subr.mxu0 %v281_v14  ;;  %700 = vmatpush3.msra.mxu1 %v391_v26 }
  0x69   : > { %669 = vmatpush3.msra.mxu0 %v281_v14  ;;  %701 = vmatprep.subr.mxu1 %v390_v27 }
  0x6a   : > { %670 = vmatprep.subr.mxu0 %v280_v15  ;;  %702 = vmatpush3.msra.mxu1 %v390_v27 }
  0x6b   : > { %671 = vmatpush3.msra.mxu0 %v280_v15  ;;  %703 = vmatprep.subr.mxu1 %v389_v28 }
  0x6c   : > { %672 = vmatprep.subr.mxu0 %v279_v16  ;;  %704 = vmatpush3.msra.mxu1 %v389_v28 }
  0x6d   : > { %673 = vmatpush3.msra.mxu0 %v279_v16  ;;  %705 = vmatprep.subr.mxu1 %v388_v29 }
  0x6e   : > { %674 = vmatprep.subr.mxu0 %v278_v17  ;;  %706 = vmatpush3.msra.mxu1 %v388_v29 }
  0x6f   : > { %675 = vmatpush3.msra.mxu0 %v278_v17  ;;  %707 = vmatprep.subr.mxu1 %v387_v30 }
  0x70   : > { %676 = vmatprep.subr.mxu0 %v277_v18  ;;  %708 = vmatpush3.msra.mxu1 %v387_v30 }
  0x71   : > { %677 = vmatpush3.msra.mxu0 %v277_v18  ;;  %709 = vmatprep.subr.mxu1 %v386_v31 }
  0x72   : > { %678 = vmatprep.subr.mxu0 %v276_v19  ;;  %710 = vmatpush3.msra.mxu1 %v386_v31 }
  0x73   : > { %679 = vmatpush3.msra.mxu0 %v276_v19  ;;  %711 = vmatprep.subr.mxu1 %v385_v32 }
  0x74   : > { %681 = vmatmul.mubr.f32.vlgmr.msra.gmra.mxu0 %v275_v20  ;;  %712 = vmatpush3.msra.mxu1 %v385_v32 }
  0x75   : > { %713 = vmatprep.subr.mxu1 %v384_v33 }
  0x76   : > { %714 = vmatpush3.msra.mxu1 %v384_v33 }
 0x134   : > { %v682_v35 = vpop.f32.mrf.mxu0 }
 0x135   : > { %v371_v36 = vadd.f32 %v682_v35, %v603_v34 }
 0x136   : > { %v365_v37 = vpop.f32.mrf.mxu0 }
 0x137   : > { %v377_v38 = vmul.f32 0.70710677, %v371_v36  ;;  %v366_v39 = vadd.f32 %v603_v34, %v365_v37  ;;  %v375_v46 = vmul.f32 0.5, %v371_v36 }
 0x139   : > { %789 = verf.f32 %v377_v38  ;;  %v376_v40 = vmul.f32 0.70710677, %v366_v39  ;;  %v374_v44 = vmul.f32 0.5, %v366_v39 }
 0x13b   : > { %791 = verf.f32 %v376_v40 }
 0x146   : > { %v790_v41 = vpop.eup %789 }
 0x147   : > { %v381_v43 = vadd.f32 1.0, %v790_v41 }
 0x148   : > { %v792_v42 = vpop.eup %791 }
 0x149   : > { %v380_v45 = vadd.f32 1.0, %v792_v42  ;;  %v383_v48 = vmul.f32 %v381_v43, %v375_v46 }
 0x14b   : > { %v382_v47 = vmul.f32 %v380_v45, %v374_v44 }
 0x14d   : > { %715 = vmatprep.mubr.f32.mxu1 %v382_v47 }
 0x14e   : > { %716 = vmatmul.mubr.f32.vlgmr.msra.gmra.mxu1 %v383_v48 }
 0x20e   : > { %v717_v50 = vpop.f32.mrf.mxu1 }
 0x20f   : > { %v479_v51 = vadd.f32 %v717_v50, %v604_v49 }
 0x210   : > { %v473_v52 = vpop.f32.mrf.mxu1 }
 0x211   : > { %483 = vst [vmem:[%s271_s12 + $0x8] sm:$0xff] %v479_v51  ;;  %v474_v53 = vadd.f32 %v604_v49, %v473_v52 }
 0x213   : > { %482 = vst [vmem:[%s271_s12] sm:$0xff] %v474_v53 }
 0x214   : > { %886 = shalt.err (!%p883_p5)
}
 0x215   : > { %s887_s13 = scalar_lea.hbm %s1148_s11, 256  ;;  %s891_s9 = scalar_lea.hbm %s1195_s5, 1024 }
 0x216   : > { %p888_p10 = scmp.ne.s32.totalorder %s1148_s11, %s887_s13  ;;  %p892_p4 = scmp.lt.s32.totalorder %s1148_s11, %s1195_s5 }
 0x217   : > { %p893_p6 = scmp.lt.s32.totalorder %s891_s9, %s887_s13 }
 0x218   : > { %p889_p9 = pnand %p888_p10, %p1212_p2 }
 0x219   : > { %p894_p8 = por %p893_p6, %p892_p4 }
 0x21a   : > { %p890_p1 = pneg %p889_p9 }
 0x21c   : > { %p895_p3 = pnand %p894_p8, %p890_p1 }
 0x21e   : > { %898 = shalt.err (!%p895_p3)
}
 0x21f   : > { %s949_s6 = smov 128   ;;  %s950_s7 = smov 8  }
 0x220   : > { %728 = dma.vmem_to_hbm [thread:$0]  (%p1212_p2), %s1143_s14, 256, %s1148_s11, %s485_s17, %s949_s6, %s949_s6, %s950_s7  }
 0x221 PF: > { %p750_p7 = scmp.ge.s32.totalorder %s941_s21, 2  ;;  %s513_s28 = sand.u32 1, %s929_s18  }
 0x222   : > { %p1213_p11 = scmp.ne.s32.totalorder %s1202_s25, 0  ;;  %s514_s16 = scalar_lea.sflag [#allocation4], %s513_s28 }
 0x224   : > { %p742_p12 = pnand %p750_p7, %p1213_p11 }
 0x226   : > { %p743_p13 = pneg %p742_p12 }
 0x228   : > { %924 = dma.done.wait (%p743_p13), %s514_s16, 256  }
 0x229   : > { %926 = vsyncadd (%p743_p13), %s514_s16, 4294967040  ;;  %p19_p0 = scmp.ge.s32.totalorder %s1058_s15, 6   ;;  %s1214_s18 = smov %s933_s19 }
 0x22a   : > { %s1215_s19 = smov %s937_s20  ;;  %s1216_s20 = smov %s1074_s27 }
 0x22b   : > { %s1217_s21 = smov %s1058_s15  ;;  %21 = sbr.rel (!%p19_p0) target bundleno = 6 (0x6), region = 93 }
 0x230   :  { %519 = vsyncpa [#allocation3], 1 }
 0x231   :  { %521 = vsyncpa [#allocation3 + $0x1], 1 }
 0x232   :  { %522 = vsyncpa [#allocation6], 1 }
 0x233   :  { %523 = vsyncpa [#allocation4], 1 }
 0x234   :  { %525 = vsyncpa [#allocation4 + $0x1], 1 }

// kernel: tpu_custom_call.1
= control target key start
LH: loop header
LB: loop body
LE: loop exit
PB: predicated region body
PF: predicated region fallthrough
CT: control target
= control target key end

     0   :  { %10 = vsyncpa [#allocation3], 0  ;;  %s1190_s0 = inlined_call_operand.hbm [shape: f32[64,128], index: 0, kind: input, shape index: {}]   ;;  %s1191_s1 = inlined_call_operand.hbm [shape: f32[128,128], index: 1, kind: input, shape index: {}]   ;;  %s1192_s2 = inlined_call_operand.vmem [shape: f32[1,128], index: 2, kind: input, shape index: {}]   ;;  %s1193_s3 = inlined_call_operand.hbm [shape: f32[128,128], index: 3, kind: input, shape index: {}]   ;;  %s1194_s4 = inlined_call_operand.vmem [shape: f32[1,128], index: 4, kind: input, shape index: {}]   ;;  %s1195_s5 = inlined_call_operand.hbm [shape: f32[64,128], index: 5, kind: output, shape index: {}]  }
   0x1   :  { %12 = vsyncpa [#allocation3 + $0x1], 0 }
   0x2   :  { %13 = vsyncpa [#allocation6], 0 }
   0x3   :  { %14 = vsyncpa [#allocation4], 0 }
   0x4   :  { %16 = vsyncpa [#allocation4 + $0x1], 0  ;;  %s981_s18 = smov 0   ;;  %s983_s19 = smov 0  }
   0x5   :  { %s985_s20 = smov 0   ;;  %s987_s21 = smov 0  }
   0x6 LB: > { %s1002_s22 = sadd.s32 4294967295, %s941_s21   ;;  %s590_s23 = sadd.s32 4294967294, %s941_s21   ;;  %s941_s21 = sphi %s987_s21, %s1217_s21   ;;  %s937_s20 = sphi %s985_s20, %s1216_s20   ;;  %s933_s19 = sphi %s983_s19, %s1215_s19   ;;  %s929_s18 = sphi %s981_s18, %s1214_s18  }
   0x7   : > { %p42_p0 = scmp.ne.s32.totalorder %s933_s19, %s929_s18  ;;  %p1196_p1 = scmp.eq.s32.totalorder %s1002_s22, 0 }
   0x8   : > { %p150_p2 = scmp.eq.s32.totalorder %s1002_s22, 3  ;;  %p156_p3 = scmp.eq.s32.totalorder %s590_s23, 3 }
   0x9   : > { %p1011_p4 = por %p1196_p1, %p42_p0  ;;  %p591_p5 = scmp.ge.s32.totalorder %s941_s21, 1 }
   0xa   : > { %p1016_p6 = por %p156_p3, %p42_p0  ;;  %p163_p7 = scmp.lt.s32.totalorder %s941_s21, 5 }
   0xb   : > { %s1201_s24 = scalar_select %p1011_p4, 1, 0 }
   0xc   : > { %s1202_s25 = scalar_select %p1016_p6, 1, 0 }
   0xd   : > { %p1021_p8 = pnand %p591_p5, %p163_p7  ;;  %s943_s27 = smov [#allocation5]  }
   0xe   : > { %s175_s28 = sshll.u32 %s943_s27, 4  ;;  %s944_s30 = smov [#allocation7]   ;;  %s176_s28 = int_to_ptr.vmem [resolvable:$true] %s175_s28 }
   0xf   : > { %s1203_s26 = scalar_select %p1021_p8, 1, 0 }
  0x10   : > { %p730_p9 = pneg %p1021_p8  ;;  %s191_s6 = sshll.u32 %s944_s30, 4  ;;  %s192_s6 = int_to_ptr.vmem [resolvable:$true] %s191_s6 }
  0x11   : > { %s804_s7 = scalar_lea.vmem %s176_s28, 2048  ;;  %p812_p3 = scmp.lt.s32.totalorder %s176_s28, %s176_s28 }
  0x12   : > { %p1029_p10 = pnand %p730_p9, %p1196_p1  ;;  %p805_p12 = scmp.ne.s32.totalorder %s176_s28, %s804_s7 }
  0x13   : > { %p813_p5 = scmp.lt.s32.totalorder %s804_s7, %s804_s7 }
  0x14   : > { %p795_p11 = pneg %p1029_p10 }
  0x15   : > { %p814_p7 = por %p813_p5, %p812_p3 }
  0x16   : > { %p807_p13 = pnand %p805_p12, %p795_p11 }
  0x18   : > { %p808_p0 = pneg %p807_p13 }
  0x1a   : > { %p815_p9 = pnand %p814_p7, %p808_p0 }
  0x1c   : > { %818 = shalt.err (!%p815_p9)
}
  0x1d   : > { %s1197_s8 = smov 128   ;;  %s946_s9 = smov 8  }
  0x1e   : > { %733 = dma.hbm_to_vmem [thread:$0]  (!%p1029_p10), %s1191_s1, 2048, %s176_s28, [#allocation6], %s1197_s8, %s1197_s8, %s946_s9  }
  0x1f   : > { %s830_s12 = scalar_lea.vmem %s192_s6, 2048  ;;  %p838_p0 = scmp.lt.s32.totalorder %s192_s6, %s192_s6 }
  0x20   : > { %p831_p12 = scmp.ne.s32.totalorder %s192_s6, %s830_s12  ;;  %p839_p5 = scmp.lt.s32.totalorder %s830_s12, %s830_s12 }
  0x22   : > { %p833_p13 = pnand %p831_p12, %p795_p11  ;;  %p840_p7 = por %p839_p5, %p838_p0 }
  0x24   : > { %p834_p3 = pneg %p833_p13 }
  0x26   : > { %p841_p9 = pnand %p840_p7, %p834_p3 }
  0x28   : > { %844 = shalt.err (!%p841_p9)
}
  0x29   : > { %736 = dma.hbm_to_vmem [thread:$0]  (!%p1029_p10), %s1193_s3, 2048, %s192_s6, [#allocation6], %s1197_s8, %s1197_s8, %s946_s9  }
  0x2a   : > { %s1058_s15 = sadd.s32 1, %s941_s21   ;;  %s29_s16 = sadd.s32 1, %s937_s20 }
  0x2b   : > { %s26_s17 = ssub.s32 %s941_s21, %s1058_s15  ;;  %p36_p11 = scmp.ne.s32.totalorder %s937_s20, %s933_s19 }
  0x2c   : > { %p27_p12 = scmp.eq.s32.totalorder %s26_s17, 0  ;;  %p37_p13 = scmp.eq.s32.totalorder %s941_s21, 0 }
  0x2d   : > { %p1068_p3 = por %p150_p2, %p36_p11  ;;  %p747_p0 = scmp.lt.s32.totalorder %s941_s21, 4 }
  0x2e   : > { %s1074_s27 = scalar_select %p27_p12, %s937_s20, %s29_s16  }
  0x2f   : > { %s1205_s23 = scalar_select %p1068_p3, 1, 0 }
  0x30   : > { %p38_p5 = por %p37_p13, %p36_p11  ;;  %s208_s28 = sand.u32 1, %s937_s20  }
  0x31   : > { %s595_s29 = sshll.u32 %s208_s28, 4  ;;  %s610_s30 = sshll.u32 %s941_s21, 8 }
  0x32   : > { %s1081_s10 = scalar_lea.hbm %s1190_s0, %s610_s30  ;;  %s212_s11 = scalar_lea.vmem [#allocation2], %s595_s29 }
  0x33   : > { %s219_s12 = sshll.u32 %s212_s11, 4  ;;  %p1085_p2 = pnand %p747_p0, %p38_p5  ;;  %s1083_s12 = int_to_ptr.vmem [resolvable:$true] %s219_s12 }
  0x34   : > { %s1089_s14 = scalar_lea.sflag [#allocation3], %s208_s28  ;;  %s845_s16 = scalar_lea.hbm %s1081_s10, 256 }
  0x35   : > { %p846_p10 = scmp.ne.s32.totalorder %s1081_s10, %s845_s16  ;;  %p847_p7 = pneg %p1085_p2 }
  0x36   : > { %s850_s29 = scalar_lea.hbm %s1190_s0, 1024  ;;  %p851_p12 = scmp.lt.s32.totalorder %s1081_s10, %s1190_s0 }
  0x37   : > { %p848_p9 = pnand %p847_p7, %p846_p10  ;;  %p852_p13 = scmp.lt.s32.totalorder %s850_s29, %s845_s16 }
  0x39   : > { %p849_p11 = pneg %p848_p9  ;;  %p853_p0 = por %p852_p13, %p851_p12 }
  0x3b   : > { %p854_p5 = pnand %p853_p0, %p849_p11 }
  0x3d   : > { %857 = shalt.err (!%p854_p5)
}
  0x3e   : > { %s858_s28 = scalar_lea.vmem %s1083_s12, 256  ;;  %s947_s11 = smov [#allocation2]  }
  0x3f   : > { %p859_p1 = scmp.ne.s32.totalorder %s1083_s12, %s858_s28  ;;  %s863_s8 = sshll.u32 %s947_s11, 4  ;;  %s864_s8 = int_to_ptr.vmem [resolvable:$false] %s863_s8 }
  0x40   : > { %s865_s17 = scalar_lea.vmem %s864_s8, 512  ;;  %p866_p9 = scmp.lt.s32.totalorder %s1083_s12, %s864_s8 }
  0x41   : > { %p861_p6 = pnand %p859_p1, %p847_p7  ;;  %p867_p3 = scmp.lt.s32.totalorder %s865_s17, %s858_s28 }
  0x43   : > { %p862_p10 = pneg %p861_p6  ;;  %p868_p4 = por %p867_p3, %p866_p9 }
  0x45   : > { %p869_p8 = pnand %p868_p4, %p862_p10 }
  0x47   : > { %872 = shalt.err (!%p869_p8)
}
  0x48   : > { %s1207_s16 = smov 128   ;;  %p1208_p1 = scmp.ne.s32.totalorder %s1203_s26, 0 }
  0x49   : > { %740 = dma.hbm_to_vmem [thread:$0]  (!%p1085_p2), %s1081_s10, 256, %s1083_s12, %s1089_s14, %s1207_s16, %s1207_s16, %s946_s9  }
  0x4a   : > { %231 = sbr.rel (%p1208_p1) target bundleno = 545 (0x221), region = 40  ;;  %s1116_s30 = sand.u32 (!%p1208_p1), 1, %s933_s19  }
  0x4b   : > { %s599_s8 = sshll.u32 (!%p1208_p1), %s1116_s30, 4  ;;  %s234_s29 = scalar_lea.sflag (!%p1208_p1), [#allocation3], %s1116_s30 }
  0x4c   : > { %s1122_s13 = scalar_lea.vmem (!%p1208_p1), [#allocation2], %s599_s8  ;;  %p1209_p4 = scmp.ne.s32.totalorder (!%p1208_p1), %s1201_s24, 0 }
  0x4f   : > { %916 = dma.done.wait (%p1209_p4), %s234_s29, 256  }
  0x50   : > { %918 = vsyncadd (%p1209_p4), %s234_s29, 4294967040  ;;  %p1210_p6 = scmp.eq.s32.totalorder %s1002_s22, 0 }
  0x52   : > { %920 = dma.done.wait (%p1210_p6), [#allocation6], 4096   ;;  %p1211_p8 = pmov %p1210_p6 }
  0x53   : > { %v291_v0 = vld [vmem:[#allocation5 + $0x78] sm:$0xff]  ;;  %v290_v1 = vld [vmem:[#allocation5 + $0x70] sm:$0xff]  ;;  %v289_v2 = vld [vmem:[#allocation5 + $0x68] sm:$0xff]  ;;  %s271_s12 = scalar_lea.vmem [#allocation8], %s599_s8  ;;  %s611_s6 = sshll.u32 %s1002_s22, 8 }
  0x54   : > { %922 = vsyncadd (%p1211_p8), [#allocation6], 4294963200  ;;  %648 = vmatprep.subr.mxu0 %v291_v0  ;;  %v288_v3 = vld [vmem:[#allocation5 + $0x60] sm:$0xff]  ;;  %v287_v5 = vld [vmem:[#allocation5 + $0x58] sm:$0xff]  ;;  %s498_s14 = sshll.u32 %s271_s12, 4  ;;  %s1148_s11 = scalar_lea.hbm %s1195_s5, %s611_s6  ;;  %s1143_s14 = int_to_ptr.vmem [resolvable:$true] %s498_s14 }
  0x55   : > { %649 = vmatpush3.msra.mxu0 %v291_v0  ;;  %v274_v4 = vld [vmem:[%s1122_s13] sm:$0xff]  ;;  %v399_v6 = vld [vmem:[#allocation7 + $0x78] sm:$0xff]  ;;  %v397_v9 = vld [vmem:[#allocation7 + $0x68] sm:$0xff]  ;;  %s485_s17 = scalar_lea.sflag [#allocation4], %s1116_s30  ;;  %s873_s16 = scalar_lea.vmem %s1143_s14, 256 }
  0x56   : > { %650 = vmatprep.subr.mxu0 %v290_v1  ;;  %680 = vmatprep.mubr.f32.mxu0 %v274_v4  ;;  %v398_v7 = vld [vmem:[#allocation7 + $0x70] sm:$0xff]  ;;  %v285_v10 = vld [vmem:[#allocation5 + $0x48] sm:$0xff]  ;;  %v284_v11 = vld [vmem:[#allocation5 + $0x40] sm:$0xff]  ;;  %p874_p3 = scmp.ne.s32.totalorder %s1143_s14, %s873_s16  ;;  %p1212_p2 = scmp.ne.s32.totalorder %s1205_s23, 0 }
  0x57   : > { %651 = vmatpush3.msra.mxu0 %v290_v1  ;;  %683 = vmatprep.subr.mxu1 %v399_v6  ;;  %v286_v8 = vld [vmem:[#allocation5 + $0x50] sm:$0xff]  ;;  %v283_v12 = vld [vmem:[#allocation5 + $0x38] sm:$0xff]  ;;  %v281_v14 = vld [vmem:[#allocation5 + $0x28] sm:$0xff]  ;;  %s948_s22 = smov [#allocation8]  }
  0x58   : > { %652 = vmatprep.subr.mxu0 %v289_v2  ;;  %684 = vmatpush3.msra.mxu1 %v399_v6  ;;  %v282_v13 = vld [vmem:[#allocation5 + $0x30] sm:$0xff]  ;;  %v280_v15 = vld [vmem:[#allocation5 + $0x20] sm:$0xff]  ;;  %v279_v16 = vld [vmem:[#allocation5 + $0x18] sm:$0xff]  ;;  %p875_p7 = pnand %p874_p3, %p1212_p2  ;;  %s877_s8 = sshll.u32 %s948_s22, 4  ;;  %s878_s8 = int_to_ptr.vmem [resolvable:$false] %s877_s8 }
  0x59   : > { %653 = vmatpush3.msra.mxu0 %v289_v2  ;;  %685 = vmatprep.subr.mxu1 %v398_v7  ;;  %v278_v17 = vld [vmem:[#allocation5 + $0x10] sm:$0xff]  ;;  %v277_v18 = vld [vmem:[#allocation5 + $0x8] sm:$0xff]  ;;  %v276_v19 = vld [vmem:[#allocation5] sm:$0xff]  ;;  %s879_s29 = scalar_lea.vmem %s878_s8, 512  ;;  %p880_p12 = scmp.lt.s32.totalorder %s1143_s14, %s878_s8 }
  0x5a   : > { %654 = vmatprep.subr.mxu0 %v288_v3  ;;  %686 = vmatpush3.msra.mxu1 %v398_v7  ;;  %v275_v20 = vld [vmem:[%s1122_s13 + $0x8] sm:$0xff]  ;;  %v396_v21 = vld [vmem:[#allocation7 + $0x60] sm:$0xff]  ;;  %v394_v23 = vld [vmem:[#allocation7 + $0x50] sm:$0xff]  ;;  %p876_p11 = pneg %p875_p7  ;;  %p881_p13 = scmp.lt.s32.totalorder %s879_s29, %s873_s16 }
  0x5b   : > { %655 = vmatpush3.msra.mxu0 %v288_v3  ;;  %687 = vmatprep.subr.mxu1 %v397_v9  ;;  %v395_v22 = vld [vmem:[#allocation7 + $0x58] sm:$0xff]  ;;  %v393_v24 = vld [vmem:[#allocation7 + $0x48] sm:$0xff]  ;;  %v392_v25 = vld [vmem:[#allocation7 + $0x40] sm:$0xff] }
  0x5c   : > { %656 = vmatprep.subr.mxu0 %v287_v5  ;;  %688 = vmatpush3.msra.mxu1 %v397_v9  ;;  %v391_v26 = vld [vmem:[#allocation7 + $0x38] sm:$0xff]  ;;  %v390_v27 = vld [vmem:[#allocation7 + $0x30] sm:$0xff]  ;;  %v389_v28 = vld [vmem:[#allocation7 + $0x28] sm:$0xff]  ;;  %p882_p0 = por %p881_p13, %p880_p12 }
  0x5d   : > { %657 = vmatpush3.msra.mxu0 %v287_v5  ;;  %689 = vmatprep.subr.mxu1 %v396_v21  ;;  %v388_v29 = vld [vmem:[#allocation7 + $0x20] sm:$0xff]  ;;  %v387_v30 = vld [vmem:[#allocation7 + $0x18] sm:$0xff]  ;;  %v386_v31 = vld [vmem:[#allocation7 + $0x10] sm:$0xff] }
  0x5e   : > { %658 = vmatprep.subr.mxu0 %v286_v8  ;;  %690 = vmatpush3.msra.mxu1 %v396_v21  ;;  %v385_v32 = vld [vmem:[#allocation7 + $0x8] sm:$0xff]  ;;  %v384_v33 = vld [vmem:[#allocation7] sm:$0xff]  ;;  %p883_p5 = pnand %p882_p0, %p876_p11 }
  0x5f   : > { %659 = vmatpush3.msra.mxu0 %v286_v8  ;;  %691 = vmatprep.subr.mxu1 %v395_v22  ;;  %v603_v34 = vld [vmem:[%s1192_s2] ss:$0 sm:$0xff] }
  0x60   : > { %660 = vmatprep.subr.mxu0 %v285_v10  ;;  %692 = vmatpush3.msra.mxu1 %v395_v22  ;;  %v604_v49 = vld [vmem:[%s1194_s4] ss:$0 sm:$0xff] }
  0x61   : > { %661 = vmatpush3.msra.mxu0 %v285_v10  ;;  %693 = vmatprep.subr.mxu1 %v394_v23 }
  0x62   : > { %662 = vmatprep.subr.mxu0 %v284_v11  ;;  %694 = vmatpush3.msra.mxu1 %v394_v23 }
  0x63   : > { %663 = vmatpush3.msra.mxu0 %v284_v11  ;;  %695 = vmatprep.subr.mxu1 %v393_v24 }
  0x64   : > { %664 = vmatprep.subr.mxu0 %v283_v12  ;;  %696 = vmatpush3.msra.mxu1 %v393_v24 }
  0x65   : > { %665 = vmatpush3.msra.mxu0 %v283_v12  ;;  %697 = vmatprep.subr.mxu1 %v392_v25 }
  0x66   : > { %666 = vmatprep.subr.mxu0 %v282_v13  ;;  %698 = vmatpush3.msra.mxu1 %v392_v25 }
  0x67   : > { %667 = vmatpush3.msra.mxu0 %v282_v13  ;;  %699 = vmatprep.subr.mxu1 %v391_v26 }
  0x68   : > { %668 = vmatprep.subr.mxu0 %v281_v14  ;;  %700 = vmatpush3.msra.mxu1 %v391_v26 }
  0x69   : > { %669 = vmatpush3.msra.mxu0 %v281_v14  ;;  %701 = vmatprep.subr.mxu1 %v390_v27 }
  0x6a   : > { %670 = vmatprep.subr.mxu0 %v280_v15  ;;  %702 = vmatpush3.msra.mxu1 %v390_v27 }
  0x6b   : > { %671 = vmatpush3.msra.mxu0 %v280_v15  ;;  %703 = vmatprep.subr.mxu1 %v389_v28 }
  0x6c   : > { %672 = vmatprep.subr.mxu0 %v279_v16  ;;  %704 = vmatpush3.msra.mxu1 %v389_v28 }
  0x6d   : > { %673 = vmatpush3.msra.mxu0 %v279_v16  ;;  %705 = vmatprep.subr.mxu1 %v388_v29 }
  0x6e   : > { %674 = vmatprep.subr.mxu0 %v278_v17  ;;  %706 = vmatpush3.msra.mxu1 %v388_v29 }
  0x6f   : > { %675 = vmatpush3.msra.mxu0 %v278_v17  ;;  %707 = vmatprep.subr.mxu1 %v387_v30 }
  0x70   : > { %676 = vmatprep.subr.mxu0 %v277_v18  ;;  %708 = vmatpush3.msra.mxu1 %v387_v30 }
  0x71   : > { %677 = vmatpush3.msra.mxu0 %v277_v18  ;;  %709 = vmatprep.subr.mxu1 %v386_v31 }
  0x72   : > { %678 = vmatprep.subr.mxu0 %v276_v19  ;;  %710 = vmatpush3.msra.mxu1 %v386_v31 }
  0x73   : > { %679 = vmatpush3.msra.mxu0 %v276_v19  ;;  %711 = vmatprep.subr.mxu1 %v385_v32 }
  0x74   : > { %681 = vmatmul.mubr.f32.vlgmr.msra.gmra.mxu0 %v275_v20  ;;  %712 = vmatpush3.msra.mxu1 %v385_v32 }
  0x75   : > { %713 = vmatprep.subr.mxu1 %v384_v33 }
  0x76   : > { %714 = vmatpush3.msra.mxu1 %v384_v33 }
 0x134   : > { %v682_v35 = vpop.f32.mrf.mxu0 }
 0x135   : > { %v371_v36 = vadd.f32 %v682_v35, %v603_v34 }
 0x136   : > { %v365_v37 = vpop.f32.mrf.mxu0 }
 0x137   : > { %v377_v38 = vmul.f32 0.70710677, %v371_v36  ;;  %v366_v39 = vadd.f32 %v603_v34, %v365_v37  ;;  %v375_v46 = vmul.f32 0.5, %v371_v36 }
 0x139   : > { %789 = verf.f32 %v377_v38  ;;  %v376_v40 = vmul.f32 0.70710677, %v366_v39  ;;  %v374_v44 = vmul.f32 0.5, %v366_v39 }
 0x13b   : > { %791 = verf.f32 %v376_v40 }
 0x146   : > { %v790_v41 = vpop.eup %789 }
 0x147   : > { %v381_v43 = vadd.f32 1.0, %v790_v41 }
 0x148   : > { %v792_v42 = vpop.eup %791 }
 0x149   : > { %v380_v45 = vadd.f32 1.0, %v792_v42  ;;  %v383_v48 = vmul.f32 %v381_v43, %v375_v46 }
 0x14b   : > { %v382_v47 = vmul.f32 %v380_v45, %v374_v44 }
 0x14d   : > { %715 = vmatprep.mubr.f32.mxu1 %v382_v47 }
 0x14e   : > { %716 = vmatmul.mubr.f32.vlgmr.msra.gmra.mxu1 %v383_v48 }
 0x20e   : > { %v717_v50 = vpop.f32.mrf.mxu1 }
 0x20f   : > { %v479_v51 = vadd.f32 %v717_v50, %v604_v49 }
 0x210   : > { %v473_v52 = vpop.f32.mrf.mxu1 }
 0x211   : > { %483 = vst [vmem:[%s271_s12 + $0x8] sm:$0xff] %v479_v51  ;;  %v474_v53 = vadd.f32 %v604_v49, %v473_v52 }
 0x213   : > { %482 = vst [vmem:[%s271_s12] sm:$0xff] %v474_v53 }
 0x214   : > { %886 = shalt.err (!%p883_p5)
}
 0x215   : > { %s887_s13 = scalar_lea.hbm %s1148_s11, 256  ;;  %s891_s9 = scalar_lea.hbm %s1195_s5, 1024 }
 0x216   : > { %p888_p10 = scmp.ne.s32.totalorder %s1148_s11, %s887_s13  ;;  %p892_p4 = scmp.lt.s32.totalorder %s1148_s11, %s1195_s5 }
 0x217   : > { %p893_p6 = scmp.lt.s32.totalorder %s891_s9, %s887_s13 }
 0x218   : > { %p889_p9 = pnand %p888_p10, %p1212_p2 }
 0x219   : > { %p894_p8 = por %p893_p6, %p892_p4 }
 0x21a   : > { %p890_p1 = pneg %p889_p9 }
 0x21c   : > { %p895_p3 = pnand %p894_p8, %p890_p1 }
 0x21e   : > { %898 = shalt.err (!%p895_p3)
}
 0x21f   : > { %s949_s6 = smov 128   ;;  %s950_s7 = smov 8  }
 0x220   : > { %728 = dma.vmem_to_hbm [thread:$0]  (%p1212_p2), %s1143_s14, 256, %s1148_s11, %s485_s17, %s949_s6, %s949_s6, %s950_s7  }
 0x221 PF: > { %p750_p7 = scmp.ge.s32.totalorder %s941_s21, 2  ;;  %s513_s28 = sand.u32 1, %s929_s18  }
 0x222   : > { %p1213_p11 = scmp.ne.s32.totalorder %s1202_s25, 0  ;;  %s514_s16 = scalar_lea.sflag [#allocation4], %s513_s28 }
 0x224   : > { %p742_p12 = pnand %p750_p7, %p1213_p11 }
 0x226   : > { %p743_p13 = pneg %p742_p12 }
 0x228   : > { %924 = dma.done.wait (%p743_p13), %s514_s16, 256  }
 0x229   : > { %926 = vsyncadd (%p743_p13), %s514_s16, 4294967040  ;;  %p19_p0 = scmp.ge.s32.totalorder %s1058_s15, 6   ;;  %s1214_s18 = smov %s933_s19 }
 0x22a   : > { %s1215_s19 = smov %s937_s20  ;;  %s1216_s20 = smov %s1074_s27 }
 0x22b   : > { %s1217_s21 = smov %s1058_s15  ;;  %21 = sbr.rel (!%p19_p0) target bundleno = 6 (0x6), region = 93 }
 0x230   :  { %519 = vsyncpa [#allocation3], 1 }
 0x231   :  { %521 = vsyncpa [#allocation3 + $0x1], 1 }
 0x232   :  { %522 = vsyncpa [#allocation6], 1 }
 0x233   :  { %523 = vsyncpa [#allocation4], 1 }
 0x234   :  { %525 = vsyncpa [#allocation4 + $0x1], 1 }

</bundles_post_ra>
